<compile_context>
chip_gen: v7x
topology: tpu7x:2x2x1
jax: 0.10.0
libtpu: 0.0.40
codegen_flags: <defaults>
</compile_context>

<pallas_src>
import functools

import jax
import jax.numpy as jnp
from jax.experimental import pallas as pl
from jax.experimental.pallas import tpu as pltpu


# ------------------------------ tiling config ------------------------------

CONV1_TILE_M = 2048     # conv1 GEMM row tile (K=15, N=128 -> tiny per-row VMEM)
CONV_TILE_M = 512       # fused conv2/conv3 row tile
GEMM_TILE_M = 512       # generic GEMM row tile (projection)
POOL_TT = 256           # pooling output-frame tile
POOL_TK = 2048          # pooling input-frame (reduction) tile
POOL_TH = 256           # pooling hidden tile (lane-dense, 2x128)


def _pick_vmem_limit():
    """64 MiB on 128-MiB-VMEM chips (v5e/v6e), 32 MiB otherwise (e.g. v7x)."""
    try:
        cap = getattr(pltpu.get_tpu_info(), "vmem_capacity_bytes", None)
        if cap is not None and cap >= 96 * 1024 * 1024:
            return 64 * 1024 * 1024
    except Exception:
        pass
    return 32 * 1024 * 1024


# ------------------------------ Pallas kernels ------------------------------

def _matmul_bias_kernel(x_ref, w_ref, b_ref, o_ref, *, relu):
    # x: (tm, K) bf16, w: (K, tn) bf16, b: (1, tn) f32 -> o: (tm, tn)
    y = jnp.dot(x_ref[...], w_ref[...], preferred_element_type=jnp.float32)
    y = y + b_ref[...]
    if relu:
        y = jnp.maximum(y, 0.0)
    o_ref[...] = y.astype(o_ref.dtype)


def pallas_matmul_bias(x, w, b, *, relu=False, tile_m=GEMM_TILE_M, tile_n=None,
                       out_dtype=jnp.float32, vmem_limit=32 * 1024 * 1024):
    """y = (relu?)(x @ w + b).  x:(M,K) bf16, w:(K,N) bf16, b:(1,N) f32."""
    M, K = x.shape
    N = w.shape[1]
    tm = M if M <= tile_m else tile_m           # small M -> single full block
    tn = N if (tile_n is None or N <= tile_n) else tile_n
    grid = (pl.cdiv(M, tm), pl.cdiv(N, tn))
    return pl.pallas_call(
        functools.partial(_matmul_bias_kernel, relu=relu),
        out_shape=jax.ShapeDtypeStruct((M, N), out_dtype),
        grid=grid,
        in_specs=[
            pl.BlockSpec((tm, K), lambda i, j: (i, 0)),
            pl.BlockSpec((K, tn), lambda i, j: (0, j)),   # weights resident
            pl.BlockSpec((1, tn), lambda i, j: (0, j)),
        ],
        out_specs=pl.BlockSpec((tm, tn), lambda i, j: (i, j)),
        compiler_params=pltpu.CompilerParams(
            dimension_semantics=("parallel", "parallel"),
            vmem_limit_bytes=vmem_limit),
    )(x, w, b)
    # TODO(synk): mark the constant-index weight/bias specs with
    # pipeline_mode=pl.Buffered(1) to drop their second VMEM buffer.


def _conv_k2s_kernel(u_ref, unext_ref, wt_ref, wb_ref, b_ref, o_ref):
    # u: (1, tm, s*C), unext: (1, 8, s*C) -> o: (1, tm, N)
    a = u_ref[0]                                   # rows U[t]       (tm, s*C)
    nxt = unext_ref[0][:1, :]                      # U[block_end]    (1,  s*C)
    a_next = jnp.concatenate([a[1:], nxt], axis=0)  # rows U[t+1]    (tm, s*C)
    y = jnp.dot(a, wt_ref[...], preferred_element_type=jnp.float32)
    y = y + jnp.dot(a_next, wb_ref[...], preferred_element_type=jnp.float32)
    y = jnp.maximum(y + b_ref[...], 0.0)
    o_ref[0] = y.astype(o_ref.dtype)


def pallas_conv_k2s(u, w_top, w_bot, b, *, n_out, tile_m=CONV_TILE_M,
                    out_dtype=jnp.bfloat16, vmem_limit=32 * 1024 * 1024):
    """Fused kernel_size==2*stride conv (channel-last, no patch materialization).

    u: (B, L_u, s*C) stride-grouped input with L_u >= n_out + 1.
    Computes y[b, t] = relu(u[b, t] @ W_top + u[b, t+1] @ W_bot + bias),
    for t in [0, n_out).
    """
    B, L_u, sC = u.shape
    N = w_top.shape[1]

    if n_out < 8:
        # tiny-input fallback: materialize the 2x-wide patches (cheap here)
        patches = jnp.concatenate([u[:, :n_out], u[:, 1:n_out + 1]], axis=-1)
        w_full = jnp.concatenate([w_top, w_bot], axis=0)
        y = pallas_matmul_bias(patches.reshape(B * n_out, 2 * sC), w_full, b,
                               relu=True, out_dtype=out_dtype,
                               vmem_limit=vmem_limit)
        return y.reshape(B, n_out, N)

    tm = min(tile_m, (n_out // 8) * 8)            # multiple of 8, <= n_out
    gm = pl.cdiv(n_out, tm)
    nsub = tm // 8
    max_blk = pl.cdiv(L_u, 8) - 1                 # last valid 8-row block of U

    return pl.pallas_call(
        _conv_k2s_kernel,
        out_shape=jax.ShapeDtypeStruct((B, n_out, N), out_dtype),
        grid=(B, gm),
        in_specs=[
            pl.BlockSpec((1, tm, sC), lambda bb, i: (bb, i, 0)),
            # halo: the 8-row block whose first row is U[(i+1)*tm] (clamped;
            # the clamped value only feeds output rows that are clipped away)
            pl.BlockSpec((1, 8, sC),
                         lambda bb, i: (bb, jnp.minimum((i + 1) * nsub, max_blk), 0)),
            pl.BlockSpec((sC, N), lambda bb, i: (0, 0)),
            pl.BlockSpec((sC, N), lambda bb, i: (0, 0)),
            pl.BlockSpec((1, N), lambda bb, i: (0, 0)),
        ],
        out_specs=pl.BlockSpec((1, tm, N), lambda bb, i: (bb, i, 0)),
        compiler_params=pltpu.CompilerParams(
            dimension_semantics=("parallel", "parallel"),
            vmem_limit_bytes=vmem_limit),
    )(u, u, w_top, w_bot, b)
    # TODO(synk): conv2 could additionally pack two time steps into N (block-
    # diagonal weight, N=256) to fill the full 256-wide MXU on v6e/v7x.


def _pool_kernel(p_ref, x_ref, o_ref, acc_ref):
    # p: (tt, tk) f32, x: (1, tk, th) bf16, acc: (tt, th) f32
    @pl.when(pl.program_id(3) == 0)
    def _():
        acc_ref[...] = jnp.zeros_like(acc_ref)
    acc_ref[...] += jnp.dot(p_ref[...], x_ref[0].astype(jnp.float32),
                            preferred_element_type=jnp.float32)
    @pl.when(pl.program_id(3) == pl.num_programs(3) - 1)
    def _():
        o_ref[0] = acc_ref[...].astype(o_ref.dtype)


def pallas_batched_pool(p, x, *, vmem_limit=32 * 1024 * 1024):
    """out[b,t,h] = sum_j p[t,j] * x[b,j,h].  p:(T_out,T_in) f32, x:(B,T_in,H)."""
    B, T_in, H = x.shape
    T_out = p.shape[0]
    th = POOL_TH if H % POOL_TH == 0 else H
    tt = T_out if T_out <= POOL_TT else POOL_TT
    if T_in <= POOL_TK:
        tk = T_in
    else:
        tk = POOL_TK
        t_pad = pl.cdiv(T_in, tk) * tk
        if t_pad != T_in:                 # zero-pad so reduction blocks are exact
            p = jnp.pad(p, ((0, 0), (0, t_pad - T_in)))
            x = jnp.pad(x, ((0, 0), (0, t_pad - T_in), (0, 0)))
            T_in = t_pad
    grid = (B, H // th, pl.cdiv(T_out, tt), T_in // tk)
    return pl.pallas_call(
        _pool_kernel,
        out_shape=jax.ShapeDtypeStruct((B, T_out, H), x.dtype),
        grid=grid,
        in_specs=[
            pl.BlockSpec((tt, tk), lambda bb, hj, to, ti: (to, ti)),
            pl.BlockSpec((1, tk, th), lambda bb, hj, to, ti: (bb, ti, hj)),
        ],
        out_specs=pl.BlockSpec((1, tt, th), lambda bb, hj, to, ti: (bb, to, hj)),
        scratch_shapes=[pltpu.VMEM((tt, th), jnp.float32)],
        compiler_params=pltpu.CompilerParams(
            dimension_semantics=("parallel", "parallel", "parallel", "arbitrary"),
            vmem_limit_bytes=vmem_limit),
    )(p.astype(jnp.float32), x)
    # TODO(synk): for very long audio replace the dense (T_out, T_in) pooling
    # matrix with a banded segment-mean kernel (scalar-prefetched start/end).


# --------------------------------- JAX glue ---------------------------------

def adaptive_pool_matrix(L_in, L_out):
    """Matrix P (L_out, L_in) reproducing F.adaptive_avg_pool1d semantics."""
    i = jnp.arange(L_out)
    starts = (i * L_in) // L_out                       # floor
    ends = -((-(i + 1) * L_in) // L_out)               # ceil
    j = jnp.arange(L_in)
    mask = (j[None, :] >= starts[:, None]) & (j[None, :] < ends[:, None])
    counts = (ends - starts).astype(jnp.float32)
    return mask.astype(jnp.float32) / counts[:, None]


class Emotion2VecExtractorPallas:
    """JAX/Pallas port of Emotion2VecExtractor (dummy wav2vec2 fallback path)."""

    def __init__(self, hidden_size=768, output_dim=256, target_fps=30.0,
                 sample_rate=16000, seed=0):
        self.hidden_size = hidden_size
        self.output_dim = output_dim
        self.target_fps = target_fps
        self.sample_rate = sample_rate
        self.vmem_limit = _pick_vmem_limit()
        self._pool_cache = {}

        key = jax.random.PRNGKey(seed)
        ks = jax.random.split(key, 8)

        def uinit(k, shape, fan_in):
            bound = 1.0 / (fan_in ** 0.5)
            return jax.random.uniform(k, shape, jnp.float32, -bound, bound)

        # PyTorch layouts: Conv1d weight (C_out, C_in, k), Linear weight (out, in)
        w1 = uinit(ks[0], (64, 1, 10), 1 * 10)
        b1 = uinit(ks[1], (64,), 1 * 10)
        w2 = uinit(ks[2], (128, 64, 8), 64 * 8)
        b2 = uinit(ks[3], (128,), 64 * 8)
        w3 = uinit(ks[4], (hidden_size, 128, 4), 128 * 4)
        b3 = uinit(ks[5], (hidden_size,), 128 * 4)
        wp = uinit(ks[6], (output_dim, hidden_size), hidden_size)
        bp = uinit(ks[7], (output_dim,), hidden_size)

        def conv_w2d(w):
            # (C_out, C_in, k) -> (k*C_in, C_out), position-major rows.
            c_out = w.shape[0]
            return jnp.transpose(w, (2, 1, 0)).reshape(-1, c_out)

        # conv1: pack TWO output steps per GEMM row -> (15, 128) weight.
        # cols [0:64]  = step 2m   (uses input offsets 0..9)
        # cols [64:128]= step 2m+1 (uses input offsets 5..14)
        w1d = conv_w2d(w1)                                     # (10, 64)
        w1p = jnp.zeros((15, 128), jnp.float32)
        w1p = w1p.at[0:10, 0:64].set(w1d)
        w1p = w1p.at[5:15, 64:128].set(w1d)
        self.w1p = w1p.astype(jnp.bfloat16)
        self.b1p = jnp.concatenate([b1, b1]).reshape(1, 128)   # f32

        # conv2 / conv3: split position-major weight into W_top (positions
        # 0..s-1, applied to U[t]) and W_bot (positions s..k-1, applied to U[t+1]).
        w2d = conv_w2d(w2).astype(jnp.bfloat16)                # (512, 128)
        self.conv2 = (w2d[:256], w2d[256:], b2.reshape(1, -1))
        w3d = conv_w2d(w3).astype(jnp.bfloat16)                # (512, 768)
        self.conv3 = (w3d[:256], w3d[256:], b3.reshape(1, -1))

        self.wp_t = wp.T.astype(jnp.bfloat16)                  # (768, 256)
        self.bp = bp.reshape(1, -1)                            # (1, 256) f32

    # ---- cached fused pooling matrix ----
    def _get_pool_matrix(self, L3, feature_len, target_seq_len):
        key = (L3, feature_len, target_seq_len)
        P = self._pool_cache.get(key)
        if P is None:
            if feature_len > 0 and feature_len != L3:
                p_resize = adaptive_pool_matrix(L3, feature_len)     # (fl, L3)
                p_fps = adaptive_pool_matrix(feature_len, target_seq_len)
                P = p_fps @ p_resize                                  # (T, L3)
            else:
                # TODO(synk): feature_len==0 with target_seq_len>0 pools L3
                # directly (may differ from torch, which resizes via feature_len).
                P = adaptive_pool_matrix(L3, target_seq_len)
            P = jax.block_until_ready(P)                              # f32
            self._pool_cache[key] = P
        return P

    def __call__(self, waveform):
        if waveform.ndim == 1:
            waveform = waveform[None, :]
        if waveform.ndim != 2:
            raise ValueError(f"Expected 1D or 2D input, got {waveform.ndim}D")
        B, L = waveform.shape

        # PyTorch conv output lengths
        L1 = (L - 10) // 5 + 1
        L2 = (L1 - 8) // 4 + 1
        L3 = (L2 - 4) // 2 + 1
        # frames each layer actually produces = frames the next layer consumes
        # (T1 <= L1, T2 <= L2; the dropped tail frames are never read downstream)
        T2 = 2 * (L3 + 1)
        T1 = 4 * (L2 + 1)
        M1 = T1 // 2                      # packed conv1 rows (2 steps per row)

        x = waveform.astype(jnp.bfloat16)

        # ---- conv1: packed GEMM, lane-dense N=128 ----
        xa = x[:, :10 * M1].reshape(B, M1, 10)
        xb = x[:, 5:10 * M1 + 5].reshape(B, M1, 10)[:, :, 5:]
        p1 = jnp.concatenate([xa, xb], axis=-1)                 # (B, M1, 15)
        h1 = pallas_matmul_bias(p1.reshape(B * M1, 15), self.w1p, self.b1p,
                                relu=True, tile_m=CONV1_TILE_M,
                                out_dtype=jnp.bfloat16,
                                vmem_limit=self.vmem_limit)     # (B*M1, 128)
        act1 = h1.reshape(B, T1, 64)                            # free reshape

        # ---- conv2 / conv3: fused patch GEMMs (no patch materialization) ----
        u2 = act1.reshape(B, L2 + 1, 256)                       # free (T1=4*(L2+1))
        act2 = pallas_conv_k2s(u2, *self.conv2, n_out=T2,
                               vmem_limit=self.vmem_limit)      # (B, T2, 128)
        u3 = act2.reshape(B, L3 + 1, 256)                       # free (T2=2*(L3+1))
        act3 = pallas_conv_k2s(u3, *self.conv3, n_out=L3,
                               vmem_limit=self.vmem_limit)      # (B, L3, 768)

        feature_len = L // (self.sample_rate // 50)
        target_seq_len = int((L / self.sample_rate) * self.target_fps)

        if target_seq_len == 0:
            # Matches the original module: zeros (B, 1, hidden) -> projection.
            h = jnp.zeros((B, 1, self.hidden_size), jnp.bfloat16)
        else:
            P = self._get_pool_matrix(L3, feature_len, target_seq_len)
            h = pallas_batched_pool(P, act3, vmem_limit=self.vmem_limit)

        # ---- output projection Linear(H -> output_dim), f32 output ----
        Bh, T, H = h.shape
        tile_n = 128 if Bh * T <= 2 * GEMM_TILE_M else None     # v7x megacore
        y = pallas_matmul_bias(h.reshape(Bh * T, H), self.wp_t, self.bp,
                               relu=False, tile_m=GEMM_TILE_M, tile_n=tile_n,
                               out_dtype=jnp.float32,
                               vmem_limit=self.vmem_limit)
        return y.reshape(Bh, T, self.output_dim)

    def get_output_length(self, input_length):
        return int((input_length / self.sample_rate) * self.target_fps)


# TODO(synk): the HuggingFace transformers Wav2Vec2 branch (processor + hidden
# state layer fusion) is not reproduced; this implements the DummyWav2Vec2Model
# fallback path (HAS_TRANSFORMERS == False).  Only pooling_method='adaptive'
# is implemented ('linear'/'conv' pooling have no kernel here).

if __name__ == "__main__":
    key = jax.random.PRNGKey(0)
    B, L = 2, 1600  # 0.1 s of 16 kHz audio -> 3 output frames at 30 fps
    waveform = jax.random.normal(key, (B, L), dtype=jnp.float32)

    extractor = Emotion2VecExtractorPallas(hidden_size=768, output_dim=256,
                                           target_fps=30.0, sample_rate=16000,
                                           seed=0)
    out = extractor(waveform)
    out = jax.block_until_ready(out)

    expected_T = extractor.get_output_length(L)  # int(0.1 * 30) = 3
    assert out.shape == (B, expected_T, 256), out.shape
    assert out.dtype == jnp.float32
    assert bool(jnp.all(jnp.isfinite(out)))
    print("KERNEL_OK")
</pallas_src>

<mosaic_0001>
module attributes {stable_mosaic.version = 11 : i64} {
  func.func @_matmul_bias_kernel(%arg0: i32, %arg1: i32, %arg2: memref<316x15xbf16, #tpu.memory_space<vmem>>, %arg3: memref<15x128xbf16, #tpu.memory_space<vmem>>, %arg4: memref<1x128xf32, #tpu.memory_space<vmem>>, %arg5: memref<316x128xbf16, #tpu.memory_space<vmem>>) attributes {dimension_semantics = [#tpu.dimension_semantics<parallel>, #tpu.dimension_semantics<parallel>], iteration_bounds = array<i64: 1, 1>, scalar_prefetch = 0 : i64, scratch_operands = 0 : i64, tpu.core_type = #tpu.core_type<tc>, window_params = [{transform_indices = @transform_0, window_bounds = array<i64: 316, 15>}, {transform_indices = @transform_1, window_bounds = array<i64: 15, 128>}, {transform_indices = @transform_2, window_bounds = array<i64: 1, 128>}, {transform_indices = @transform_3, window_bounds = array<i64: 316, 128>}]} {
    %c0 = arith.constant 0 : index
    %c0_0 = arith.constant 0 : index
    %0 = vector.load %arg2[%c0, %c0_0] : memref<316x15xbf16, #tpu.memory_space<vmem>>, vector<316x15xbf16>
    %c0_1 = arith.constant 0 : index
    %c0_2 = arith.constant 0 : index
    %1 = vector.load %arg3[%c0_1, %c0_2] : memref<15x128xbf16, #tpu.memory_space<vmem>>, vector<15x128xbf16>
    %cst = arith.constant dense<0.000000e+00> : vector<316x128xf32>
    %2 = tpu.matmul %0, %1, %cst {dimension_numbers = #tpu.dot_dimension_numbers<[1], [0], [0], [1], [0, 0, 1, 1], [], []>} : vector<316x15xbf16>, vector<15x128xbf16>, vector<316x128xf32> -> vector<316x128xf32>
    %c0_3 = arith.constant 0 : index
    %c0_4 = arith.constant 0 : index
    %3 = vector.load %arg4[%c0_3, %c0_4] : memref<1x128xf32, #tpu.memory_space<vmem>>, vector<1x128xf32>
    %4 = vector.broadcast %3 : vector<1x128xf32> to vector<316x128xf32>
    %5 = arith.addf %2, %4 : vector<316x128xf32>
    %cst_5 = arith.constant 0.000000e+00 : f32
    %6 = vector.broadcast %cst_5 : f32 to vector<316x128xf32>
    %7 = arith.maximumf %5, %6 : vector<316x128xf32>
    %8 = arith.truncf %7 : vector<316x128xf32> to vector<316x128xbf16>
    %c0_6 = arith.constant 0 : index
    %c0_7 = arith.constant 0 : index
    %9 = vector.load %arg5[%c0_6, %c0_7] : memref<316x128xbf16, #tpu.memory_space<vmem>>, vector<316x128xbf16>
    tpu.vector_store %arg5[%c0_6, %c0_7], %8 {strides = array<i32>} : memref<316x128xbf16, #tpu.memory_space<vmem>>, vector<316x128xbf16>,
    return
  }
  func.func @transform_0(%arg0: i32, %arg1: i32) -> (i32, i32) {
    %c0_i32 = arith.constant 0 : i32
    %c0_i32_0 = arith.constant 0 : i32
    return %arg0, %c0_i32 : i32, i32
  }
  func.func @transform_1(%arg0: i32, %arg1: i32) -> (i32, i32) {
    %c0_i32 = arith.constant 0 : i32
    %c0_i32_0 = arith.constant 0 : i32
    return %c0_i32, %arg1 : i32, i32
  }
  func.func @transform_2(%arg0: i32, %arg1: i32) -> (i32, i32) {
    %c0_i32 = arith.constant 0 : i32
    %c0_i32_0 = arith.constant 0 : i32
    return %c0_i32, %arg1 : i32, i32
  }
  func.func @transform_3(%arg0: i32, %arg1: i32) -> (i32, i32) {
    %c0_i32 = arith.constant 0 : i32
    return %arg0, %arg1 : i32, i32
  }
}

</mosaic_0001>

<bundles_post_ra>
// kernel: tpu_custom_call.1
= control target key start
LH: loop header
LB: loop body
LE: loop exit
PB: predicated region body
PF: predicated region fallthrough
CT: control target
= control target key end

     0   :  { %vm231_vm0 = vcmask 1046528   ;;  %vm232_vm1 = vcmask 1047552   ;;  %v1036_v1 = vmov 65535   ;;  %vm170_vm2 = vcmask 121856   ;;  %s1200_s0 = inlined_call_operand.vmem [shape: bf16[316,15], index: 0, kind: input, shape index: {}]   ;;  %s1201_s1 = inlined_call_operand.vmem [shape: bf16[15,128], index: 1, kind: input, shape index: {}]   ;;  %s1202_s2 = inlined_call_operand.vmem [shape: f32[1,128], index: 2, kind: input, shape index: {}]   ;;  %s1203_s3 = inlined_call_operand.hbm [shape: bf16[316,128], index: 3, kind: output, shape index: {}]  }
   0x1   :  { %v991_v0 = vld [vmem:[%s1201_s1] sm:$0xff]   ;;  %v233_v2 = vsel %vm231_vm0, 4294967295, %v1036_v1  ;;  %v993_v4 = vld [vmem:[%s1200_s0 + $0x50] sm:$0xff]   ;;  %v994_v7 = vld [vmem:[%s1200_s0 + $0x8] sm:$0xff]  }
   0x2   :  { %v992_v3 = vld [vmem:[%s1200_s0] sm:$0xff]   ;;  %v234_v5 = vsel %vm232_vm1, %v233_v2, 0  ;;  %965 = vmatprep.mubr.msk.bf16.mxu1 %vm170_vm2, %v993_v4  ;;  %v995_v8 = vld [vmem:[%s1200_s0 + $0x58] sm:$0xff]   ;;  %v996_v9 = vld [vmem:[%s1200_s0 + $0x10] sm:$0xff]  }
   0x3   :  { %v236_v6 = vand.u32 %v991_v0, %v234_v5  ;;  %945 = vmatprep.mubr.msk.bf16.mxu0 %vm170_vm2, %v992_v3  ;;  %v997_v10 = vld [vmem:[%s1200_s0 + $0x60] sm:$0xff]   ;;  %v998_v11 = vld [vmem:[%s1200_s0 + $0x18] sm:$0xff]   ;;  %v999_v12 = vld [vmem:[%s1200_s0 + $0x68] sm:$0xff]  }
   0x4   :  { %v1000_v13 = vld [vmem:[%s1200_s0 + $0x20] sm:$0xff]   ;;  %v1001_v14 = vld [vmem:[%s1200_s0 + $0x70] sm:$0xff]  }
   0x5   :  { %943 = vmatprep.subr.bf16.mxu0 %v236_v6  ;;  %985 = vmatprep.subr.bf16.mxu1 %v236_v6 }
   0x6   :  { %944 = vmatpush3.bf16.msra.mxu0 %v236_v6  ;;  %986 = vmatpush3.bf16.msra.mxu1 %v236_v6 }
   0x9   :  { %946 = vmatmul.mubr.msk.bf16.vlgmr.msra.gmra.mrb[0].mxu0 %vm170_vm2, %v994_v7  ;;  %966 = vmatmul.mubr.msk.bf16.vlgmr.msra.gmra.mrb[0].mxu1 %vm170_vm2, %v995_v8 }
   0xa   :  { %949 = vmatprep.mubr.msk.bf16.mxu0 %vm170_vm2, %v996_v9  ;;  %969 = vmatprep.mubr.msk.bf16.mxu1 %vm170_vm2, %v997_v10 }
  0x11   :  { %950 = vmatmul.mubr.msk.bf16.gmra.mrb[4].mxu0 %vm170_vm2, %v998_v11  ;;  %970 = vmatmul.mubr.msk.bf16.gmra.mrb[4].mxu1 %vm170_vm2, %v999_v12 }
  0x12   :  { %953 = vmatprep.mubr.msk.bf16.mxu0 %vm170_vm2, %v1000_v13  ;;  %973 = vmatprep.mubr.msk.bf16.mxu1 %vm170_vm2, %v1001_v14 }
  0x13   :  { %8 = vsyncpa [#allocation3], 0  ;;  %v1002_v15 = vld [vmem:[%s1200_s0 + $0x28] sm:$0xff]   ;;  %v1003_v16 = vld [vmem:[%s1200_s0 + $0x78] sm:$0xff]  }
  0x14   :  { %v1004_v17 = vld [vmem:[%s1200_s0 + $0x30] sm:$0xff]   ;;  %v1005_v18 = vld [vmem:[%s1200_s0 + $0x80] sm:$0xff]   ;;  %v1006_v19 = vld [vmem:[%s1200_s0 + $0x38] sm:$0xff]  }
  0x15   :  { %v1007_v20 = vld [vmem:[%s1200_s0 + $0x88] sm:$0xff]   ;;  %v1008_v21 = vld [vmem:[%s1200_s0 + $0x40] sm:$0xff]   ;;  %v1009_v22 = vld [vmem:[%s1200_s0 + $0x90] sm:$0xff]  }
  0x16   :  { %v1010_v23 = vld [vmem:[%s1200_s0 + $0x48] sm:$0xff]   ;;  %v1011_v24 = vld [vmem:[%s1200_s0 + $0x98] sm:$0x3f]   ;;  %v1146_v25 = vld [vmem:[%s1202_s2] ss:$0 sm:$0xff]  ;;  %s1037_s0 = smov [#allocation2]  }
  0x17   :  { %s676_s2 = sshll.u32 %s1037_s0, 4  ;;  %s677_s2 = int_to_ptr.vmem [resolvable:$true] %s676_s2 }
  0x18   :  { %s1012_s27 = scalar_lea.vmem %s677_s2, 2560  ;;  %p1017_p1 = scmp.lt.s32.totalorder %s677_s2, %s677_s2 }
  0x19   :  { %954 = vmatmul.mubr.msk.bf16.gmra.mrb[8].mxu0 %vm170_vm2, %v1002_v15  ;;  %974 = vmatmul.mubr.msk.bf16.gmra.mrb[8].mxu1 %vm170_vm2, %v1003_v16  ;;  %p1013_p0 = scmp.ne.s32.totalorder %s677_s2, %s1012_s27  ;;  %p1018_p2 = scmp.lt.s32.totalorder %s1012_s27, %s1012_s27 }
  0x1a   :  { %957 = vmatprep.mubr.msk.bf16.mxu0 %vm170_vm2, %v1004_v17  ;;  %977 = vmatprep.mubr.msk.bf16.mxu1 %vm170_vm2, %v1005_v18 }
  0x1b   :  { %p1019_p3 = por %p1018_p2, %p1017_p1 }
  0x1d   :  { %p1020_p4 = pnand %p1019_p3, %p1013_p0 }
  0x21   :  { %958 = vmatmul.mubr.msk.bf16.gmra.mrb[12].mxu0 %vm170_vm2, %v1006_v19  ;;  %978 = vmatmul.mubr.msk.bf16.gmra.mrb[12].mxu1 %vm170_vm2, %v1007_v20 }
  0x22   :  { %961 = vmatprep.mubr.msk.bf16.mxu0 %vm170_vm2, %v1008_v21  ;;  %981 = vmatprep.mubr.msk.bf16.mxu1 %vm170_vm2, %v1009_v22 }
  0x29   :  { %962 = vmatmul.mubr.msk.bf16.gmra.mrb[16].mxu0 %vm170_vm2, %v1010_v23  ;;  %982 = vmatmul.mubr.msk.bf16.gmra.mrb[16].mxu1 %vm170_vm2, %v1011_v24 }
  0xdc   :  { %v947_v26 = vpop.f32.mrb[0].mxu0  ;;  %v967_v27 = vpop.f32.mrb[0].mxu1 }
  0xdd   :  { %v281_v28 = vadd.f32 %v947_v26, %v1146_v25  ;;  %v361_v29 = vadd.f32 %v967_v27, %v1146_v25  ;;  %v272_v30 = vpop.f32.mrb[1].mxu0  ;;  %v352_v31 = vpop.f32.mrb[1].mxu1 }
  0xde   :  { %v273_v32 = vadd.f32 %v1146_v25, %v272_v30  ;;  %v353_v33 = vadd.f32 %v1146_v25, %v352_v31  ;;  %v948_v34 = vpop.f32.mrb[2].mxu0  ;;  %v968_v35 = vpop.f32.mrb[2].mxu1 }
  0xdf   :  { %v284_v36 = vadd.f32 %v948_v34, %v1146_v25  ;;  %v364_v37 = vadd.f32 %v968_v35, %v1146_v25  ;;  %v275_v38 = vpop.f32.mrb[3].mxu0  ;;  %v355_v39 = vpop.f32.mrb[3].mxu1  ;;  %v433_v42 = vmax.f32 %v281_v28, 0.0  ;;  %v453_v43 = vmax.f32 %v361_v29, 0.0 }
  0xe0   :  { %v276_v40 = vadd.f32 %v1146_v25, %v275_v38  ;;  %v356_v41 = vadd.f32 %v1146_v25, %v355_v39  ;;  %v431_v46 = vmax.f32 %v273_v32, 0.0  ;;  %v451_v47 = vmax.f32 %v353_v33, 0.0 }
  0xe1   :  { %v434_v44 = vmax.f32 %v284_v36, 0.0  ;;  %v454_v45 = vmax.f32 %v364_v37, 0.0 }
  0xe2   :  { %v432_v48 = vmax.f32 %v276_v40, 0.0  ;;  %v452_v49 = vmax.f32 %v356_v41, 0.0 }
  0xe3   :  { %v817_v50 = vpack.c.bf16 %v434_v44, %v433_v42  ;;  %v867_v51 = vpack.c.bf16 %v454_v45, %v453_v43 }
  0xe4   :  { %v812_v52 = vpack.c.bf16 %v432_v48, %v431_v46  ;;  %v862_v53 = vpack.c.bf16 %v452_v49, %v451_v47  ;;  %v951_v54 = vpop.f32.mrb[4].mxu0  ;;  %v971_v55 = vpop.f32.mrb[4].mxu1 }
  0xe5   :  { %904 = vst [vmem:[#allocation2 + $0x8] sm:$0xff] %v817_v50   ;;  %914 = vst [vmem:[#allocation2 + $0x58] sm:$0xff] %v867_v51   ;;  %v297_v56 = vadd.f32 %v951_v54, %v1146_v25  ;;  %v377_v57 = vadd.f32 %v971_v55, %v1146_v25  ;;  %v288_v58 = vpop.f32.mrb[5].mxu0  ;;  %v368_v59 = vpop.f32.mrb[5].mxu1 }
  0xe6   :  { %813 = vst [vmem:[#allocation2] sm:$0xff] %v812_v52   ;;  %913 = vst [vmem:[#allocation2 + $0x50] sm:$0xff] %v862_v53   ;;  %v289_v60 = vadd.f32 %v1146_v25, %v288_v58  ;;  %v369_v61 = vadd.f32 %v1146_v25, %v368_v59  ;;  %v952_v62 = vpop.f32.mrb[6].mxu0  ;;  %v972_v63 = vpop.f32.mrb[6].mxu1 }
  0xe7   :  { %v300_v0 = vadd.f32 %v952_v62, %v1146_v25  ;;  %v380_v1 = vadd.f32 %v972_v63, %v1146_v25  ;;  %v291_v2 = vpop.f32.mrb[7].mxu0  ;;  %v371_v3 = vpop.f32.mrb[7].mxu1  ;;  %v437_v6 = vmax.f32 %v297_v56, 0.0  ;;  %v457_v7 = vmax.f32 %v377_v57, 0.0 }
  0xe8   :  { %v292_v4 = vadd.f32 %v1146_v25, %v291_v2  ;;  %v372_v5 = vadd.f32 %v1146_v25, %v371_v3  ;;  %v435_v10 = vmax.f32 %v289_v60, 0.0  ;;  %v455_v11 = vmax.f32 %v369_v61, 0.0 }
  0xe9   :  { %v438_v8 = vmax.f32 %v300_v0, 0.0  ;;  %v458_v9 = vmax.f32 %v380_v1, 0.0 }
  0xea   :  { %v436_v12 = vmax.f32 %v292_v4, 0.0  ;;  %v456_v13 = vmax.f32 %v372_v5, 0.0 }
  0xeb   :  { %v827_v14 = vpack.c.bf16 %v438_v8, %v437_v6  ;;  %v877_v15 = vpack.c.bf16 %v458_v9, %v457_v7 }
  0xec   :  { %v822_v16 = vpack.c.bf16 %v436_v12, %v435_v10  ;;  %v872_v17 = vpack.c.bf16 %v456_v13, %v455_v11  ;;  %v955_v18 = vpop.f32.mrb[8].mxu0  ;;  %v975_v19 = vpop.f32.mrb[8].mxu1 }
  0xed   :  { %906 = vst [vmem:[#allocation2 + $0x18] sm:$0xff] %v827_v14   ;;  %916 = vst [vmem:[#allocation2 + $0x68] sm:$0xff] %v877_v15   ;;  %v313_v20 = vadd.f32 %v955_v18, %v1146_v25  ;;  %v393_v21 = vadd.f32 %v975_v19, %v1146_v25  ;;  %v304_v22 = vpop.f32.mrb[9].mxu0  ;;  %v384_v23 = vpop.f32.mrb[9].mxu1 }
  0xee   :  { %905 = vst [vmem:[#allocation2 + $0x10] sm:$0xff] %v822_v16   ;;  %915 = vst [vmem:[#allocation2 + $0x60] sm:$0xff] %v872_v17   ;;  %v305_v24 = vadd.f32 %v1146_v25, %v304_v22  ;;  %v385_v26 = vadd.f32 %v1146_v25, %v384_v23  ;;  %v956_v27 = vpop.f32.mrb[10].mxu0  ;;  %v976_v28 = vpop.f32.mrb[10].mxu1 }
  0xef   :  { %v316_v29 = vadd.f32 %v956_v27, %v1146_v25  ;;  %v396_v30 = vadd.f32 %v976_v28, %v1146_v25  ;;  %v307_v31 = vpop.f32.mrb[11].mxu0  ;;  %v387_v32 = vpop.f32.mrb[11].mxu1  ;;  %v441_v35 = vmax.f32 %v313_v20, 0.0  ;;  %v461_v36 = vmax.f32 %v393_v21, 0.0 }
  0xf0   :  { %v308_v33 = vadd.f32 %v1146_v25, %v307_v31  ;;  %v388_v34 = vadd.f32 %v1146_v25, %v387_v32  ;;  %v439_v39 = vmax.f32 %v305_v24, 0.0  ;;  %v459_v40 = vmax.f32 %v385_v26, 0.0 }
  0xf1   :  { %v442_v37 = vmax.f32 %v316_v29, 0.0  ;;  %v462_v38 = vmax.f32 %v396_v30, 0.0 }
  0xf2   :  { %v440_v41 = vmax.f32 %v308_v33, 0.0  ;;  %v460_v42 = vmax.f32 %v388_v34, 0.0 }
  0xf3   :  { %v837_v43 = vpack.c.bf16 %v442_v37, %v441_v35  ;;  %v887_v44 = vpack.c.bf16 %v462_v38, %v461_v36 }
  0xf4   :  { %v832_v45 = vpack.c.bf16 %v440_v41, %v439_v39  ;;  %v882_v46 = vpack.c.bf16 %v460_v42, %v459_v40  ;;  %v959_v47 = vpop.f32.mrb[12].mxu0  ;;  %v979_v48 = vpop.f32.mrb[12].mxu1 }
  0xf5   :  { %908 = vst [vmem:[#allocation2 + $0x28] sm:$0xff] %v837_v43   ;;  %918 = vst [vmem:[#allocation2 + $0x78] sm:$0xff] %v887_v44   ;;  %v329_v49 = vadd.f32 %v959_v47, %v1146_v25  ;;  %v409_v50 = vadd.f32 %v979_v48, %v1146_v25  ;;  %v320_v51 = vpop.f32.mrb[13].mxu0  ;;  %v400_v52 = vpop.f32.mrb[13].mxu1 }
  0xf6   :  { %907 = vst [vmem:[#allocation2 + $0x20] sm:$0xff] %v832_v45   ;;  %917 = vst [vmem:[#allocation2 + $0x70] sm:$0xff] %v882_v46   ;;  %v321_v53 = vadd.f32 %v1146_v25, %v320_v51  ;;  %v401_v54 = vadd.f32 %v1146_v25, %v400_v52  ;;  %v960_v55 = vpop.f32.mrb[14].mxu0  ;;  %v980_v56 = vpop.f32.mrb[14].mxu1 }
  0xf7   :  { %v332_v57 = vadd.f32 %v960_v55, %v1146_v25  ;;  %v412_v58 = vadd.f32 %v980_v56, %v1146_v25  ;;  %v323_v59 = vpop.f32.mrb[15].mxu0  ;;  %v403_v60 = vpop.f32.mrb[15].mxu1  ;;  %v445_v63 = vmax.f32 %v329_v49, 0.0  ;;  %v465_v0 = vmax.f32 %v409_v50, 0.0 }
  0xf8   :  { %v324_v61 = vadd.f32 %v1146_v25, %v323_v59  ;;  %v404_v62 = vadd.f32 %v1146_v25, %v403_v60  ;;  %v443_v3 = vmax.f32 %v321_v53, 0.0  ;;  %v463_v4 = vmax.f32 %v401_v54, 0.0 }
  0xf9   :  { %v446_v1 = vmax.f32 %v332_v57, 0.0  ;;  %v466_v2 = vmax.f32 %v412_v58, 0.0 }
  0xfa   :  { %v444_v5 = vmax.f32 %v324_v61, 0.0  ;;  %v464_v6 = vmax.f32 %v404_v62, 0.0 }
  0xfb   :  { %v847_v7 = vpack.c.bf16 %v446_v1, %v445_v63  ;;  %v897_v8 = vpack.c.bf16 %v466_v2, %v465_v0 }
  0xfc   :  { %v842_v9 = vpack.c.bf16 %v444_v5, %v443_v3  ;;  %v892_v10 = vpack.c.bf16 %v464_v6, %v463_v4  ;;  %v963_v11 = vpop.f32.mrb[16].mxu0  ;;  %v983_v12 = vpop.f32.mrb[16].mxu1 }
  0xfd   :  { %910 = vst [vmem:[#allocation2 + $0x38] sm:$0xff] %v847_v7   ;;  %920 = vst [vmem:[#allocation2 + $0x88] sm:$0xff] %v897_v8   ;;  %v345_v13 = vadd.f32 %v963_v11, %v1146_v25  ;;  %v425_v14 = vadd.f32 %v983_v12, %v1146_v25  ;;  %v336_v15 = vpop.f32.mrb[17].mxu0  ;;  %v416_v16 = vpop.f32.mrb[17].mxu1 }
  0xfe   :  { %909 = vst [vmem:[#allocation2 + $0x30] sm:$0xff] %v842_v9   ;;  %919 = vst [vmem:[#allocation2 + $0x80] sm:$0xff] %v892_v10   ;;  %v337_v17 = vadd.f32 %v1146_v25, %v336_v15  ;;  %v417_v18 = vadd.f32 %v1146_v25, %v416_v16  ;;  %v964_v19 = vpop.f32.mrb[18].mxu0  ;;  %v984_v20 = vpop.f32.mrb[18].mxu1 }
  0xff   :  { %v469_v21 = vmax.f32 %v425_v14, 0.0  ;;  %v348_v22 = vadd.f32 %v964_v19, %v1146_v25  ;;  %v428_v23 = vadd.f32 %v984_v20, %v1146_v25  ;;  %v339_v24 = vpop.f32.mrb[19].mxu0  ;;  %v419_v26 = vpop.f32.mrb[19].mxu1  ;;  %v449_v29 = vmax.f32 %v345_v13, 0.0 }
 0x100   :  { %v340_v27 = vadd.f32 %v1146_v25, %v339_v24  ;;  %v420_v28 = vadd.f32 %v1146_v25, %v419_v26  ;;  %v447_v33 = vmax.f32 %v337_v17, 0.0  ;;  %v467_v34 = vmax.f32 %v417_v18, 0.0 }
 0x101   :  { %v807_v30 = vpack.c.bf16 %v469_v21, %v469_v21  ;;  %v450_v31 = vmax.f32 %v348_v22, 0.0  ;;  %v470_v32 = vmax.f32 %v428_v23, 0.0 }
 0x102   :  { %v448_v35 = vmax.f32 %v340_v27, 0.0  ;;  %v468_v36 = vmax.f32 %v420_v28, 0.0 }
 0x103   :  { %669 = vst [vmem:[#allocation2 + $0x98] sm:$0xf] %v807_v30  ;;  %v857_v37 = vpack.c.bf16 %v450_v31, %v449_v29  ;;  %v808_v38 = vpack.c.bf16 %v470_v32, %v470_v32 }
 0x104   :  { %v852_v39 = vpack.c.bf16 %v448_v35, %v447_v33  ;;  %v902_v40 = vpack.c.bf16 %v468_v36, %v467_v34 }
 0x105   :  { %912 = vst [vmem:[#allocation2 + $0x48] sm:$0xff] %v857_v37   ;;  %670 = vst [vmem:[#allocation2 + $0x9c] sm:$0x3] %v808_v38 }
 0x106   :  { %911 = vst [vmem:[#allocation2 + $0x40] sm:$0xff] %v852_v39   ;;  %921 = vst [vmem:[#allocation2 + $0x90] sm:$0xff] %v902_v40  }
 0x107   :  { %1023 = shalt.err (!%p1020_p4)
}
 0x108   :  { %s1024_s30 = scalar_lea.hbm %s1203_s3, 2560 }
 0x109   :  { %p1025_p5 = scmp.ne.s32.totalorder %s1203_s3, %s1024_s30  ;;  %p1028_p6 = scmp.lt.u32.totalorder %s1024_s30, %s1203_s3 }
 0x10b   :  { %p1030_p7 = pnand %p1028_p6, %p1025_p5 }
 0x10d   :  { %1033 = shalt.err (!%p1030_p7)
}
 0x10e   :  { %s1038_s8 = smov 64   ;;  %s1039_s9 = smov 4  }
 0x10f   :  { %682 = dma.vmem_to_hbm [thread:$0]  %s677_s2, 2560, %s1203_s3, [#allocation3], %s1038_s8, %s1038_s8, %s1039_s9  }
 0x110   :  { %1034 = dma.done.wait [#allocation3], 2560  }
 0x111   :  { %1035 = vsyncadd [#allocation3], 4294964736 }
 0x112   :  { %686 = vsyncpa [#allocation3], 1 }

</bundles_post_ra>
